<compile_context>
chip_gen: v6e
topology: v6e:2x2x1
jax: 0.10.0
libtpu: 0.0.40
codegen_flags: <defaults>
</compile_context>

<pallas_src>
import functools

import jax
import jax.numpy as jnp
from jax.experimental import pallas as pl
from jax.experimental.pallas import tpu as pltpu


def _round_up(n, m):
    return ((n + m - 1) // m) * m


def _choose_block_b(batch, max_block):
    """Batch tile: multiple of 8 sublanes, minimal padding for small batches,
    capped for large batches, and split so a >=256-row batch gives v7x's two
    TensorCores at least one tile each."""
    b8 = _round_up(batch, 8)
    if b8 <= max_block:
        if b8 >= 256 and (b8 // 2) % 8 == 0:
            return b8 // 2
        return b8
    return max_block


def dqn_kernel(x_ref, w1_ref, b1_ref, w2_ref, b2_ref, w3_ref, b3_ref, o_ref):
    # Layer 1: cast x f32->bf16 on the VPU (plenty of slack), MXU dot, fp32 acc.
    x = x_ref[...].astype(w1_ref.dtype)
    h1 = jnp.dot(x, w1_ref[...], preferred_element_type=jnp.float32)
    h1 = jnp.maximum(h1 + b1_ref[...], 0.0)
    # Layer 2: bf16 operands, fp32 accumulation.
    h2 = jnp.dot(h1.astype(w2_ref.dtype), w2_ref[...],
                 preferred_element_type=jnp.float32)
    h2 = jnp.maximum(h2 + b2_ref[...], 0.0)
    # Layer 3 kept fully f32 (W3 is f32): preserves Q-value precision for argmax.
    out = jnp.dot(h2, w3_ref[...], preferred_element_type=jnp.float32)
    # Lane-dense (block_b, 128) store; padded columns are exact zeros.
    o_ref[...] = (out + b3_ref[...]).astype(o_ref.dtype)


@functools.partial(jax.jit, static_argnames=("output_dim", "max_block_b"))
def dqn_forward(x, w1, b1, w2, b2, w3p, b3p, *, output_dim, max_block_b=512):
    B, D = x.shape
    H = w1.shape[1]
    Op = w3p.shape[1]          # lane-dense padded output width (multiple of 128)
    out_dtype = x.dtype

    block_b = _choose_block_b(B, max_block_b)
    Bp = _round_up(B, block_b)
    xp = x if Bp == B else jnp.pad(x, ((0, Bp - B), (0, 0)))

    grid = (Bp // block_b,)

    flops = 2 * Bp * (D * H + H * H + H * Op)
    bytes_accessed = (
        Bp * D * x.dtype.itemsize                 # x read
        + Bp * Op * jnp.dtype(out_dtype).itemsize  # out write
        + (w1.size + w2.size) * 2                  # bf16 weights
        + w3p.size * 4                             # f32 final weight
        + (b1.size + b2.size + b3p.size) * 4)      # f32 biases

    out = pl.pallas_call(
        dqn_kernel,
        out_shape=jax.ShapeDtypeStruct((Bp, Op), out_dtype),
        grid_spec=pltpu.PrefetchScalarGridSpec(
            num_scalar_prefetch=0,
            grid=grid,
            in_specs=[
                pl.BlockSpec((block_b, D), lambda i: (i, 0)),  # x tile (batch-tiled)
                pl.BlockSpec((D, H), lambda i: (0, 0)),        # W1 (VMEM-resident)
                pl.BlockSpec((1, H), lambda i: (0, 0)),        # b1
                pl.BlockSpec((H, H), lambda i: (0, 0)),        # W2
                pl.BlockSpec((1, H), lambda i: (0, 0)),        # b2
                pl.BlockSpec((H, Op), lambda i: (0, 0)),       # W3 (padded, f32)
                pl.BlockSpec((1, Op), lambda i: (0, 0)),       # b3 (padded, f32)
            ],
            out_specs=pl.BlockSpec((block_b, Op), lambda i: (i, 0)),
        ),
        compiler_params=pltpu.CompilerParams(
            dimension_semantics=("parallel",),   # batch tiles shard across TCs (v7x)
        ),
        cost_estimate=pl.CostEstimate(
            flops=flops, transcendentals=0, bytes_accessed=bytes_accessed),
    )(xp, w1, b1, w2, b2, w3p, b3p)

    # Drop batch padding and the lane-padding columns.
    return out[:B, :output_dim]


def prepare_dqn_params(w1, b1, w2, b2, w3, b3):
    """One-time (outside the hot loop) conversion to kernel-ready layout.

    W1/W2 -> bf16; W3 and all biases -> f32; W3/b3 zero-padded to a lane-dense
    multiple of 128 output columns.  Returns (params_tuple, output_dim)."""
    O = w3.shape[1]
    Op = _round_up(O, 128)
    w3p = jnp.zeros((w3.shape[0], Op), jnp.float32).at[:, :O].set(
        w3.astype(jnp.float32))
    b3p = jnp.zeros((1, Op), jnp.float32).at[:, :O].set(
        jnp.reshape(b3, (1, -1)).astype(jnp.float32))
    params = (
        w1.astype(jnp.bfloat16),
        jnp.reshape(b1, (1, -1)).astype(jnp.float32),
        w2.astype(jnp.bfloat16),
        jnp.reshape(b2, (1, -1)).astype(jnp.float32),
        w3p,
        b3p,
    )
    return params, O


def init_dqn_params(key, input_dim, output_dim, hidden=128, dtype=jnp.float32):
    """PyTorch nn.Linear default init (uniform +-1/sqrt(fan_in)); weights are
    returned already transposed to (in_features, out_features)."""
    def linear_init(k, fan_in, fan_out):
        kw, kb = jax.random.split(k)
        bound = 1.0 / jnp.sqrt(float(fan_in))
        w = jax.random.uniform(kw, (fan_in, fan_out), dtype, minval=-bound, maxval=bound)
        b = jax.random.uniform(kb, (fan_out,), dtype, minval=-bound, maxval=bound)
        return w, b

    k1, k2, k3 = jax.random.split(key, 3)
    w1, b1 = linear_init(k1, input_dim, hidden)
    w2, b2 = linear_init(k2, hidden, hidden)
    w3, b3 = linear_init(k3, hidden, output_dim)
    return w1, b1, w2, b2, w3, b3


def dqn_reference(x, w1, b1, w2, b2, w3, b3):
    # Pure fp32 reference (PyTorch-equivalent forward).
    h1 = jnp.maximum(x @ w1 + b1, 0.0)
    h2 = jnp.maximum(h1 @ w2 + b2, 0.0)
    return h2 @ w3 + b3


if __name__ == "__main__":
    key = jax.random.PRNGKey(0)
    k_params, k_x = jax.random.split(key)

    batch, input_dim, output_dim = 8, 16, 4
    raw_params = init_dqn_params(k_params, input_dim, output_dim, hidden=128)
    x = jax.random.normal(k_x, (batch, input_dim), jnp.float32)

    kernel_params, out_dim = prepare_dqn_params(*raw_params)
    out = dqn_forward(x, *kernel_params, output_dim=out_dim)
    out = jax.block_until_ready(out)

    ref = dqn_reference(x, *raw_params)
    assert out.shape == (batch, output_dim)
    # Layers 1/2 use bf16 operands (fp32 accum), layer 3 is fully f32.
    assert jnp.allclose(out, ref, atol=5e-2, rtol=5e-2), "mismatch vs reference"
    print("KERNEL_OK")
</pallas_src>

<mosaic_0001>
module attributes {stable_mosaic.version = 11 : i64} {
  func.func @dqn_kernel(%arg0: i32, %arg1: memref<8x16xf32, #tpu.memory_space<vmem>>, %arg2: memref<16x128xbf16, #tpu.memory_space<vmem>>, %arg3: memref<1x128xf32, #tpu.memory_space<vmem>>, %arg4: memref<128x128xbf16, #tpu.memory_space<vmem>>, %arg5: memref<1x128xf32, #tpu.memory_space<vmem>>, %arg6: memref<128x128xf32, #tpu.memory_space<vmem>>, %arg7: memref<1x128xf32, #tpu.memory_space<vmem>>, %arg8: memref<8x128xf32, #tpu.memory_space<vmem>>) attributes {dimension_semantics = [#tpu.dimension_semantics<parallel>], iteration_bounds = array<i64: 1>, scalar_prefetch = 0 : i64, scratch_operands = 0 : i64, tpu.core_type = #tpu.core_type<tc>, window_params = [{transform_indices = @transform_0, window_bounds = array<i64: 8, 16>}, {pipeline_mode = #tpu.pipeline_mode<synchronous>, transform_indices = @transform_1, window_bounds = array<i64: 16, 128>}, {pipeline_mode = #tpu.pipeline_mode<synchronous>, transform_indices = @transform_2, window_bounds = array<i64: 1, 128>}, {pipeline_mode = #tpu.pipeline_mode<synchronous>, transform_indices = @transform_3, window_bounds = array<i64: 128, 128>}, {pipeline_mode = #tpu.pipeline_mode<synchronous>, transform_indices = @transform_4, window_bounds = array<i64: 1, 128>}, {pipeline_mode = #tpu.pipeline_mode<synchronous>, transform_indices = @transform_5, window_bounds = array<i64: 128, 128>}, {pipeline_mode = #tpu.pipeline_mode<synchronous>, transform_indices = @transform_6, window_bounds = array<i64: 1, 128>}, {transform_indices = @transform_7, window_bounds = array<i64: 8, 128>}]} {
    %c0 = arith.constant 0 : index
    %c0_0 = arith.constant 0 : index
    %0 = vector.load %arg1[%c0, %c0_0] : memref<8x16xf32, #tpu.memory_space<vmem>>, vector<8x16xf32>
    %1 = arith.truncf %0 : vector<8x16xf32> to vector<8x16xbf16>
    %c0_1 = arith.constant 0 : index
    %c0_2 = arith.constant 0 : index
    %2 = vector.load %arg2[%c0_1, %c0_2] : memref<16x128xbf16, #tpu.memory_space<vmem>>, vector<16x128xbf16>
    %cst = arith.constant dense<0.000000e+00> : vector<8x128xf32>
    %3 = tpu.matmul %1, %2, %cst {dimension_numbers = #tpu.dot_dimension_numbers<[1], [0], [0], [1], [0, 0, 1, 1], [], []>} : vector<8x16xbf16>, vector<16x128xbf16>, vector<8x128xf32> -> vector<8x128xf32>
    %c0_3 = arith.constant 0 : index
    %c0_4 = arith.constant 0 : index
    %4 = vector.load %arg3[%c0_3, %c0_4] : memref<1x128xf32, #tpu.memory_space<vmem>>, vector<1x128xf32>
    %5 = vector.broadcast %4 : vector<1x128xf32> to vector<8x128xf32>
    %6 = arith.addf %3, %5 : vector<8x128xf32>
    %cst_5 = arith.constant 0.000000e+00 : f32
    %7 = vector.broadcast %cst_5 : f32 to vector<8x128xf32>
    %8 = arith.maximumf %6, %7 : vector<8x128xf32>
    %9 = arith.truncf %8 : vector<8x128xf32> to vector<8x128xbf16>
    %c0_6 = arith.constant 0 : index
    %c0_7 = arith.constant 0 : index
    %10 = vector.load %arg4[%c0_6, %c0_7] : memref<128x128xbf16, #tpu.memory_space<vmem>>, vector<128x128xbf16>
    %cst_8 = arith.constant dense<0.000000e+00> : vector<8x128xf32>
    %11 = tpu.matmul %9, %10, %cst_8 {dimension_numbers = #tpu.dot_dimension_numbers<[1], [0], [0], [1], [0, 0, 1, 1], [], []>} : vector<8x128xbf16>, vector<128x128xbf16>, vector<8x128xf32> -> vector<8x128xf32>
    %c0_9 = arith.constant 0 : index
    %c0_10 = arith.constant 0 : index
    %12 = vector.load %arg5[%c0_9, %c0_10] : memref<1x128xf32, #tpu.memory_space<vmem>>, vector<1x128xf32>
    %13 = vector.broadcast %12 : vector<1x128xf32> to vector<8x128xf32>
    %14 = arith.addf %11, %13 : vector<8x128xf32>
    %cst_11 = arith.constant 0.000000e+00 : f32
    %15 = vector.broadcast %cst_11 : f32 to vector<8x128xf32>
    %16 = arith.maximumf %14, %15 : vector<8x128xf32>
    %c0_12 = arith.constant 0 : index
    %c0_13 = arith.constant 0 : index
    %17 = vector.load %arg6[%c0_12, %c0_13] : memref<128x128xf32, #tpu.memory_space<vmem>>, vector<128x128xf32>
    %cst_14 = arith.constant dense<0.000000e+00> : vector<8x128xf32>
    %18 = tpu.matmul %16, %17, %cst_14 {dimension_numbers = #tpu.dot_dimension_numbers<[1], [0], [0], [1], [0, 0, 1, 1], [], []>} : vector<8x128xf32>, vector<128x128xf32>, vector<8x128xf32> -> vector<8x128xf32>
    %c0_15 = arith.constant 0 : index
    %c0_16 = arith.constant 0 : index
    %19 = vector.load %arg7[%c0_15, %c0_16] : memref<1x128xf32, #tpu.memory_space<vmem>>, vector<1x128xf32>
    %20 = vector.broadcast %19 : vector<1x128xf32> to vector<8x128xf32>
    %21 = arith.addf %18, %20 : vector<8x128xf32>
    %c0_17 = arith.constant 0 : index
    %c0_18 = arith.constant 0 : index
    %22 = vector.load %arg8[%c0_17, %c0_18] : memref<8x128xf32, #tpu.memory_space<vmem>>, vector<8x128xf32>
    tpu.vector_store %arg8[%c0_17, %c0_18], %21 {strides = array<i32>} : memref<8x128xf32, #tpu.memory_space<vmem>>, vector<8x128xf32>,
    return
  }
  func.func @transform_0(%arg0: i32) -> (i32, i32) {
    %c0_i32 = arith.constant 0 : i32
    %c0_i32_0 = arith.constant 0 : i32
    return %arg0, %c0_i32 : i32, i32
  }
  func.func @transform_1(%arg0: i32) -> (i32, i32) {
    %c0_i32 = arith.constant 0 : i32
    %c0_i32_0 = arith.constant 0 : i32
    %c0_i32_1 = arith.constant 0 : i32
    return %c0_i32, %c0_i32_0 : i32, i32
  }
  func.func @transform_2(%arg0: i32) -> (i32, i32) {
    %c0_i32 = arith.constant 0 : i32
    %c0_i32_0 = arith.constant 0 : i32
    %c0_i32_1 = arith.constant 0 : i32
    return %c0_i32, %c0_i32_0 : i32, i32
  }
  func.func @transform_3(%arg0: i32) -> (i32, i32) {
    %c0_i32 = arith.constant 0 : i32
    %c0_i32_0 = arith.constant 0 : i32
    %c0_i32_1 = arith.constant 0 : i32
    return %c0_i32, %c0_i32_0 : i32, i32
  }
  func.func @transform_4(%arg0: i32) -> (i32, i32) {
    %c0_i32 = arith.constant 0 : i32
    %c0_i32_0 = arith.constant 0 : i32
    %c0_i32_1 = arith.constant 0 : i32
    return %c0_i32, %c0_i32_0 : i32, i32
  }
  func.func @transform_5(%arg0: i32) -> (i32, i32) {
    %c0_i32 = arith.constant 0 : i32
    %c0_i32_0 = arith.constant 0 : i32
    %c0_i32_1 = arith.constant 0 : i32
    return %c0_i32, %c0_i32_0 : i32, i32
  }
  func.func @transform_6(%arg0: i32) -> (i32, i32) {
    %c0_i32 = arith.constant 0 : i32
    %c0_i32_0 = arith.constant 0 : i32
    %c0_i32_1 = arith.constant 0 : i32
    return %c0_i32, %c0_i32_0 : i32, i32
  }
  func.func @transform_7(%arg0: i32) -> (i32, i32) {
    %c0_i32 = arith.constant 0 : i32
    %c0_i32_0 = arith.constant 0 : i32
    return %arg0, %c0_i32 : i32, i32
  }
}

</mosaic_0001>

<bundles_post_ra>
// kernel: dqn_forward.1
= control target key start
LH: loop header
LB: loop body
LE: loop exit
PB: predicated region body
PF: predicated region fallthrough
CT: control target
= control target key end

     0   :  { %12 = vsyncpa [#allocation3], 0  ;;  %s665_s0 = inlined_call_operand.hbm [shape: f32[8,16], index: 0, kind: input, shape index: {}]   ;;  %s666_s1 = inlined_call_operand.hbm [shape: bf16[16,128], index: 1, kind: input, shape index: {}]   ;;  %s667_s2 = inlined_call_operand.vmem [shape: f32[1,128], index: 2, kind: input, shape index: {}]   ;;  %s668_s3 = inlined_call_operand.hbm [shape: bf16[128,128], index: 3, kind: input, shape index: {}]   ;;  %s669_s4 = inlined_call_operand.vmem [shape: f32[1,128], index: 4, kind: input, shape index: {}]   ;;  %s670_s5 = inlined_call_operand.hbm [shape: f32[128,128], index: 5, kind: input, shape index: {}]   ;;  %s671_s6 = inlined_call_operand.vmem [shape: f32[1,128], index: 6, kind: input, shape index: {}]   ;;  %s672_s7 = inlined_call_operand.vmem [shape: f32[8,128], index: 7, kind: output, shape index: {}]  }
   0x1   :  { %13 = vsyncpa [#allocation5], 0 }
   0x2   :  { %14 = vsyncpa [#allocation8], 0  ;;  %s563_s24 = smov [#allocation4]  }
   0x3   :  { %s30_s25 = sshll.u32 %s563_s24, 4  ;;  %s31_s25 = int_to_ptr.vmem [resolvable:$true] %s30_s25 }
   0x4   :  { %s485_s26 = scalar_lea.vmem %s31_s25, 128  ;;  %p490_p1 = scmp.lt.s32.totalorder %s31_s25, %s31_s25 }
   0x5   :  { %p486_p0 = scmp.ne.s32.totalorder %s31_s25, %s485_s26  ;;  %p491_p2 = scmp.lt.s32.totalorder %s485_s26, %s485_s26 }
   0x7   :  { %p492_p3 = por %p491_p2, %p490_p1 }
   0x9   :  { %p493_p4 = pnand %p492_p3, %p486_p0 }
   0xb   :  { %496 = shalt.err (!%p493_p4)
}
   0xc   :  { %s564_s27 = smov 64   ;;  %s565_s28 = smov 4  }
   0xd   :  { %36 = dma.hbm_to_vmem [thread:$0]  %s666_s1, 128, %s31_s25, [#allocation5], %s564_s27, %s564_s27, %s565_s28  }
   0xe   :  { %s566_s8 = smov [#allocation2]   ;;  %s567_s10 = smov [#allocation6]  }
   0xf   :  { %s21_s9 = sshll.u32 %s566_s8, 4  ;;  %s44_s11 = sshll.u32 %s567_s10, 4  ;;  %s22_s9 = int_to_ptr.vmem [resolvable:$true] %s21_s9  ;;  %s45_s11 = int_to_ptr.vmem [resolvable:$true] %s44_s11 }
  0x10   :  { %s505_s12 = scalar_lea.vmem %s22_s9, 128  ;;  %p510_p6 = scmp.lt.s32.totalorder %s22_s9, %s22_s9 }
  0x11   :  { %p506_p5 = scmp.ne.s32.totalorder %s22_s9, %s505_s12  ;;  %p511_p7 = scmp.lt.s32.totalorder %s505_s12, %s505_s12 }
  0x13   :  { %p512_p8 = por %p511_p7, %p510_p6 }
  0x15   :  { %p513_p9 = pnand %p512_p8, %p506_p5 }
  0x17   :  { %516 = shalt.err (!%p513_p9)
}
  0x18   :  { %24 = dma.hbm_to_vmem [thread:$0]  %s665_s0, 128, %s22_s9, [#allocation3]  }
  0x19   :  { %s525_s15 = scalar_lea.vmem %s45_s11, 1024  ;;  %p530_p11 = scmp.lt.s32.totalorder %s45_s11, %s45_s11 }
  0x1a   :  { %p526_p10 = scmp.ne.s32.totalorder %s45_s11, %s525_s15  ;;  %p531_p12 = scmp.lt.s32.totalorder %s525_s15, %s525_s15 }
  0x1c   :  { %p532_p13 = por %p531_p12, %p530_p11 }
  0x1e   :  { %p533_p0 = pnand %p532_p13, %p526_p10 }
  0x20   :  { %536 = shalt.err (!%p533_p0)
}
  0x21   :  { %50 = dma.hbm_to_vmem [thread:$0]  %s668_s3, 1024, %s45_s11, [#allocation5], %s564_s27, %s564_s27, %s565_s28  }
  0x22   :  { %s568_s17 = smov [#allocation7]  }
  0x23   :  { %s58_s18 = sshll.u32 %s568_s17, 4  ;;  %s59_s18 = int_to_ptr.vmem [resolvable:$true] %s58_s18 }
  0x24   :  { %s545_s19 = scalar_lea.vmem %s59_s18, 2048  ;;  %p550_p2 = scmp.lt.s32.totalorder %s59_s18, %s59_s18 }
  0x25   :  { %p546_p1 = scmp.ne.s32.totalorder %s59_s18, %s545_s19  ;;  %p551_p3 = scmp.lt.s32.totalorder %s545_s19, %s545_s19 }
  0x27   :  { %p552_p4 = por %p551_p3, %p550_p2 }
  0x29   :  { %p553_p5 = pnand %p552_p4, %p546_p1 }
  0x2b   :  { %556 = shalt.err (!%p553_p5)
}
  0x2c   :  { %s569_s0 = smov 128   ;;  %s570_s20 = smov 8  }
  0x2d   :  { %64 = dma.hbm_to_vmem [thread:$0]  %s670_s5, 2048, %s59_s18, [#allocation8], %s569_s0, %s569_s0, %s570_s20  }
  0x2e   :  { %557 = dma.done.wait [#allocation3], 128  }
  0x2f   :  { %558 = vsyncadd [#allocation3], 4294967168 }
  0x30   :  { %559 = dma.done.wait [#allocation5], 1152  }
  0x31   :  { %560 = vsyncadd [#allocation5], 4294966144 }
  0x32   :  { %561 = dma.done.wait [#allocation8], 2048  }
  0x33   :  { %562 = vsyncadd [#allocation8], 4294965248  ;;  %v571_v0 = vmov 0.0   ;;  %vm572_vm0 = vmmov 0   ;;  %v468_v1 = vld [vmem:[#allocation4] sm:$0xff]   ;;  %v80_v2 = vld [vmem:[#allocation2] sm:$0xff] }
  0x34   :  { %397 = vmatprep.subr.bf16.mxu0 %v571_v0  ;;  %399 = vmatprep.mubr.msk.bf16.mxu0 %vm572_vm0, %v571_v0  ;;  %v81_v3 = vpack.c.bf16 %v80_v2, %v80_v2  ;;  %vm97_vm1 = vcmask 130048   ;;  %v469_v4 = vld [vmem:[#allocation6 + $0x38] sm:$0xff]   ;;  %v470_v5 = vld [vmem:[#allocation6 + $0x30] sm:$0xff]   ;;  %v471_v6 = vld [vmem:[#allocation6 + $0x28] sm:$0xff]  }
  0x35   :  { %403 = vmatprep.subr.bf16.mxu1 %v571_v0  ;;  %419 = vmatprep.mubr.msk.bf16.mxu1 %vm572_vm0, %v571_v0  ;;  %v472_v7 = vld [vmem:[#allocation6 + $0x20] sm:$0xff]   ;;  %v473_v8 = vld [vmem:[#allocation6 + $0x18] sm:$0xff]   ;;  %v474_v9 = vld [vmem:[#allocation6 + $0x10] sm:$0xff]  }
  0x36   :  { %398 = vmatpush3.bf16.msra.mxu0 %v468_v1  ;;  %404 = vmatpush3.bf16.msra.mxu1 %v469_v4  ;;  %v475_v10 = vld [vmem:[#allocation6 + $0x8] sm:$0xff]   ;;  %v476_v11 = vld [vmem:[#allocation6] sm:$0xff]   ;;  %v270_v12 = vld [vmem:[#allocation7 + $0x78] sm:$0xff] }
  0x37   :  { %423 = vmatprep.subr.mxu0 %v571_v0  ;;  %405 = vmatprep.subr.bf16.mxu1 %v571_v0  ;;  %v269_v13 = vld [vmem:[#allocation7 + $0x70] sm:$0xff]  ;;  %v268_v14 = vld [vmem:[#allocation7 + $0x68] sm:$0xff]  ;;  %v267_v15 = vld [vmem:[#allocation7 + $0x60] sm:$0xff] }
  0x38   :  { %v266_v16 = vld [vmem:[#allocation7 + $0x58] sm:$0xff]  ;;  %v265_v17 = vld [vmem:[#allocation7 + $0x50] sm:$0xff]  ;;  %v264_v18 = vld [vmem:[#allocation7 + $0x48] sm:$0xff] }
  0x39   :  { %400 = vmatmul.mubr.msk.bf16.vlgmr.msra.gmra.mxu0 %vm97_vm1, %v81_v3  ;;  %v263_v19 = vld [vmem:[#allocation7 + $0x40] sm:$0xff]  ;;  %v262_v20 = vld [vmem:[#allocation7 + $0x38] sm:$0xff]  ;;  %v261_v21 = vld [vmem:[#allocation7 + $0x30] sm:$0xff] }
  0x3a   :  { %455 = vmatprep.mubr.msk.f32.mxu0 %vm572_vm0, %v571_v0  ;;  %406 = vmatpush3.bf16.msra.mxu1 %v470_v5  ;;  %v260_v22 = vld [vmem:[#allocation7 + $0x28] sm:$0xff]  ;;  %v259_v23 = vld [vmem:[#allocation7 + $0x20] sm:$0xff]  ;;  %v258_v24 = vld [vmem:[#allocation7 + $0x18] sm:$0xff] }
  0x3b   :  { %407 = vmatprep.subr.bf16.mxu1 %v571_v0  ;;  %424 = vmatpush3.msra.mxu0 %v270_v12  ;;  %v356_v25 = vld [vmem:[%s667_s2] ss:$0 sm:$0xff]  ;;  %v256_v34 = vld [vmem:[#allocation7 + $0x8] sm:$0xff]  ;;  %v255_v35 = vld [vmem:[#allocation7] sm:$0xff] }
  0x3c   :  { %425 = vmatprep.subr.mxu0 %v571_v0  ;;  %v257_v33 = vld [vmem:[#allocation7 + $0x10] sm:$0xff] }
  0x3d   :  { %426 = vmatpush3.msra.mxu0 %v269_v13  ;;  %v359_v36 = vld [vmem:[%s669_s4] ss:$0 sm:$0xff] }
  0x3e   :  { %408 = vmatpush3.bf16.msra.mxu1 %v471_v6  ;;  %427 = vmatprep.subr.mxu0 %v571_v0  ;;  %v368_v43 = vld [vmem:[%s671_s6] ss:$0 sm:$0xff] }
  0x3f   :  { %409 = vmatprep.subr.bf16.mxu1 %v571_v0  ;;  %428 = vmatpush3.msra.mxu0 %v268_v14 }
  0x40   :  { %429 = vmatprep.subr.mxu0 %v571_v0 }
  0x41   :  { %430 = vmatpush3.msra.mxu0 %v267_v15 }
  0x42   :  { %410 = vmatpush3.bf16.msra.mxu1 %v472_v7  ;;  %431 = vmatprep.subr.mxu0 %v571_v0 }
  0x43   :  { %411 = vmatprep.subr.bf16.mxu1 %v571_v0  ;;  %432 = vmatpush3.msra.mxu0 %v266_v16 }
  0x44   :  { %433 = vmatprep.subr.mxu0 %v571_v0 }
  0x45   :  { %434 = vmatpush3.msra.mxu0 %v265_v17 }
  0x46   :  { %412 = vmatpush3.bf16.msra.mxu1 %v473_v8  ;;  %435 = vmatprep.subr.mxu0 %v571_v0 }
  0x47   :  { %413 = vmatprep.subr.bf16.mxu1 %v571_v0  ;;  %436 = vmatpush3.msra.mxu0 %v264_v18 }
  0x48   :  { %437 = vmatprep.subr.mxu0 %v571_v0 }
  0x49   :  { %438 = vmatpush3.msra.mxu0 %v263_v19 }
  0x4a   :  { %414 = vmatpush3.bf16.msra.mxu1 %v474_v9  ;;  %439 = vmatprep.subr.mxu0 %v571_v0 }
  0x4b   :  { %415 = vmatprep.subr.bf16.mxu1 %v571_v0  ;;  %440 = vmatpush3.msra.mxu0 %v262_v20 }
  0x4c   :  { %441 = vmatprep.subr.mxu0 %v571_v0 }
  0x4d   :  { %442 = vmatpush3.msra.mxu0 %v261_v21 }
  0x4e   :  { %416 = vmatpush3.bf16.msra.mxu1 %v475_v10  ;;  %443 = vmatprep.subr.mxu0 %v571_v0 }
  0x4f   :  { %417 = vmatprep.subr.bf16.mxu1 %v571_v0  ;;  %444 = vmatpush3.msra.mxu0 %v260_v22 }
  0x50   :  { %445 = vmatprep.subr.mxu0 %v571_v0 }
  0x51   :  { %446 = vmatpush3.msra.mxu0 %v259_v23 }
  0x52   :  { %418 = vmatpush3.bf16.msra.mxu1 %v476_v11  ;;  %447 = vmatprep.subr.mxu0 %v571_v0 }
  0x53   :  { %448 = vmatpush3.msra.mxu0 %v258_v24 }
  0x54   :  { %449 = vmatprep.subr.mxu0 %v571_v0 }
  0x55   :  { %450 = vmatpush3.msra.mxu0 %v257_v33 }
  0x56   :  { %451 = vmatprep.subr.mxu0 %v571_v0 }
  0x57   :  { %452 = vmatpush3.msra.mxu0 %v256_v34 }
  0x58   :  { %453 = vmatprep.subr.mxu0 %v571_v0 }
  0x59   :  { %454 = vmatpush3.msra.mxu0 %v255_v35 }
  0xf9   :  { %v135_v26 = vpop.f32.mrf.mxu0 }
  0xfa   :  { %v136_v27 = vadd.f32 %v356_v25, %v135_v26 }
  0xfb   :  { %v401_v28 = vpop.f32.mrf.mxu0 }
  0xfc   :  { %v141_v29 = vmax.f32 %v136_v27, 0.0 }
  0xfd   :  { %v138_v30 = vpop.f32.mrf.mxu0 }
  0xfe   :  { %v142_v31 = vpack.c.bf16 %v141_v29, %v141_v29 }
  0xff   :  { %v402_v32 = vpop.f32.mrf.mxu0 }
 0x100   :  { %420 = vmatmul.mubr.bf16.vlgmr.msra.gmra.mxu1 %v142_v31 }
 0x1c0   :  { %v248_v37 = vpop.f32.mrf.mxu1 }
 0x1c1   :  { %v249_v38 = vadd.f32 %v359_v36, %v248_v37 }
 0x1c2   :  { %v421_v39 = vpop.f32.mrf.mxu1 }
 0x1c3   :  { %v254_v40 = vmax.f32 %v249_v38, 0.0 }
 0x1c4   :  { %v251_v41 = vpop.f32.mrf.mxu1 }
 0x1c5   :  { %456 = vmatmul.mubr.f32.vlgmr.msra.gmra.mxu0 %v254_v40 }
 0x1c6   :  { %v422_v42 = vpop.f32.mrf.mxu1 }
 0x285   :  { %v344_v44 = vpop.f32.mrf.mxu0 }
 0x286   :  { %v345_v45 = vadd.f32 %v368_v43, %v344_v44 }
 0x287   :  { %v457_v46 = vpop.f32.mrf.mxu0 }
 0x288   :  { %348 = vst [vmem:[%s672_s7] sm:$0xff] %v345_v45 }
 0x289   :  { %353 = vsyncpa [#allocation3], 1 }
 0x28a   :  { %354 = vsyncpa [#allocation5], 1 }
 0x28b   :  { %355 = vsyncpa [#allocation8], 1 }

</bundles_post_ra>
